<compile_context>
chip_gen: v5e
topology: v5e:2x2
jax: 0.10.0
libtpu: 0.0.40
codegen_flags: <defaults>
</compile_context>

<pallas_src>
import functools

import jax
import jax.numpy as jnp
from jax.experimental import pallas as pl
from jax.experimental.pallas import tpu as pltpu

IN_FEATS = 3 * 32 * 32          # 3072 (already a multiple of 128)
H1, H2, OUT = 92, 46, 10        # logical (PyTorch) feature widths
H1P, H2P, OUTP = 128, 128, 128  # lane-aligned padded widths

TB_MAX = 1024                   # max batch-tile rows (f32 x tile = 12 MiB at 1024)


def _round_up(x, m):
    return ((x + m - 1) // m) * m


def _cdiv(a, b):
    return -(-a // b)


def _choose_batch_tiling(B, tb_max=TB_MAX):
    """Pick (TB, B_pad) so that:
       * TB is a multiple of 8 (sublanes) and <= tb_max,
       * B_pad = n_tiles * TB with B_pad - B < TB (no ~2x padding waste),
       * n_tiles >= 2 whenever B >= 16 (both v7x TensorCores get work)."""
    B8 = _round_up(max(B, 1), 8)
    n_tiles = _cdiv(B8, tb_max)
    if n_tiles == 1 and B8 >= 16:
        n_tiles = 2
    TB = _round_up(_cdiv(B8, n_tiles), 8)
    B_pad = TB * n_tiles
    return TB, B_pad


def _resident_spec(shape):
    """BlockSpec for a grid-invariant (always block (0,0)) operand.

    Single-buffered when pipeline_mode=pl.Buffered(1) is available; falls back to a
    plain (double-buffered) spec otherwise — these operands are tiny either way.
    """
    if hasattr(pl, "Buffered"):
        try:
            return pl.BlockSpec(shape, lambda i: (0, 0), pipeline_mode=pl.Buffered(1))
        except TypeError:
            pass
    return pl.BlockSpec(shape, lambda i: (0, 0))


def _mlp_kernel(x_ref, w1_ref, b1_ref, w2_ref, b2_ref, w3_ref, b3_ref, o_ref):
    # x arrives as f32 and is cast to the weights' compute dtype (bf16) here on the VPU;
    # the kernel is HBM-bound, so the cast rides in idle VALU slots for free.
    x = x_ref[...].astype(w1_ref.dtype)

    # Layer 1: (TB, 3072) @ (3072, 128) -> f32 acc, f32 bias + ReLU
    h1 = jnp.dot(x, w1_ref[...], preferred_element_type=jnp.float32)
    h1 = jnp.maximum(h1 + b1_ref[...], 0.0)

    # Layer 2
    h2 = jnp.dot(h1.astype(w2_ref.dtype), w2_ref[...],
                 preferred_element_type=jnp.float32)
    h2 = jnp.maximum(h2 + b2_ref[...], 0.0)

    # Layer 3 (logits; lane-dense 128-wide store, f32)
    out = jnp.dot(h2.astype(w3_ref.dtype), w3_ref[...],
                  preferred_element_type=jnp.float32)
    o_ref[...] = (out + b3_ref[...]).astype(o_ref.dtype)


def init_params(key):
    """PyTorch-style params: weight (out, in), bias (out,), U(-1/sqrt(fan_in), +)."""
    ks = jax.random.split(key, 6)

    def linear(kw, kb, fan_in, fan_out):
        bound = 1.0 / jnp.sqrt(float(fan_in))
        w = jax.random.uniform(kw, (fan_out, fan_in), jnp.float32, -bound, bound)
        b = jax.random.uniform(kb, (fan_out,), jnp.float32, -bound, bound)
        return w, b

    w1, b1 = linear(ks[0], ks[1], IN_FEATS, H1)
    w2, b2 = linear(ks[2], ks[3], H1, H2)
    w3, b3 = linear(ks[4], ks[5], H2, OUT)
    return (w1, b1, w2, b2, w3, b3)


def prepare_params(params, compute_dtype=jnp.bfloat16):
    """Transpose to (in, out), zero-pad to lane-aligned widths, cast weights.

    Biases stay f32 (bias add / ReLU are done in f32 inside the kernel).
    """
    w1, b1, w2, b2, w3, b3 = params

    def pad_w(w, in_p, out_p):
        wt = w.T  # (in, out)
        wp = jnp.zeros((in_p, out_p), jnp.float32)
        wp = wp.at[: wt.shape[0], : wt.shape[1]].set(wt)
        return wp.astype(compute_dtype)

    def pad_b(b, out_p):
        return jnp.zeros((1, out_p), jnp.float32).at[0, : b.shape[0]].set(b)

    return (
        pad_w(w1, IN_FEATS, H1P), pad_b(b1, H1P),
        pad_w(w2, H1P, H2P),      pad_b(b2, H2P),
        pad_w(w3, H2P, OUTP),     pad_b(b3, OUTP),
    )


@jax.jit
def simple_cifar10_forward(x_nchw, prepared_params):
    """x_nchw: (B, 3, 32, 32) float32. Returns logits (B, 10) float32."""
    w1p, b1p, w2p, b2p, w3p, b3p = prepared_params
    B = x_nchw.shape[0]

    # Flatten with the same C,H,W ordering as torch's .view; NO wrapper-level cast —
    # the kernel streams f32 and casts per-tile on-chip (halves end-to-end x traffic).
    x_flat = x_nchw.reshape(B, IN_FEATS)

    TB, B_pad = _choose_batch_tiling(B)
    if B_pad != B:
        x_flat = jnp.pad(x_flat, ((0, B_pad - B), (0, 0)))

    grid = (B_pad // TB,)

    flops = 2 * B_pad * (IN_FEATS * H1P + H1P * H2P + H2P * OUTP)
    bytes_accessed = (
        B_pad * IN_FEATS * 4                                        # x read (f32)
        + sum(p.size * p.dtype.itemsize for p in prepared_params)   # params
        + B_pad * OUTP * 4                                          # logits write (f32)
    )

    out_padded = pl.pallas_call(
        _mlp_kernel,
        out_shape=jax.ShapeDtypeStruct((B_pad, OUTP), jnp.float32),
        grid=grid,
        in_specs=[
            pl.BlockSpec((TB, IN_FEATS), lambda i: (i, 0)),   # x tiles, double-buffered
            _resident_spec((IN_FEATS, H1P)),                  # weights stay VMEM-resident
            _resident_spec((1, H1P)),
            _resident_spec((H1P, H2P)),
            _resident_spec((1, H2P)),
            _resident_spec((H2P, OUTP)),
            _resident_spec((1, OUTP)),
        ],
        out_specs=pl.BlockSpec((TB, OUTP), lambda i: (i, 0)),  # lane-dense (128) stores
        compiler_params=pltpu.CompilerParams(
            dimension_semantics=("parallel",),
            vmem_limit_bytes=48 << 20,
        ),
        cost_estimate=pl.CostEstimate(
            flops=flops, transcendentals=0, bytes_accessed=bytes_accessed
        ),
    )(x_flat, w1p, b1p, w2p, b2p, w3p, b3p)

    # Strip batch padding and the lane padding of the logits.
    return out_padded[:B, :OUT]


if __name__ == "__main__":
    key = jax.random.PRNGKey(0)
    k_params, k_x = jax.random.split(key)

    params = init_params(k_params)
    prepared = prepare_params(params, compute_dtype=jnp.bfloat16)

    B = 4
    x = jax.random.normal(k_x, (B, 3, 32, 32), jnp.float32)  # NCHW like PyTorch

    out = simple_cifar10_forward(x, prepared)
    out = jax.block_until_ready(out)
    assert out.shape == (B, OUT)

    w1, b1, w2, b2, w3, b3 = params

    # Reference 1: same bf16-input / f32-accumulate math as the kernel (tight check).
    cd = jnp.bfloat16
    xr = x.reshape(B, -1).astype(cd)
    h1 = jnp.maximum(
        jnp.dot(xr, w1.T.astype(cd), preferred_element_type=jnp.float32) + b1, 0.0)
    h2 = jnp.maximum(
        jnp.dot(h1.astype(cd), w2.T.astype(cd), preferred_element_type=jnp.float32) + b2, 0.0)
    ref_q = jnp.dot(h2.astype(cd), w3.T.astype(cd), preferred_element_type=jnp.float32) + b3
    assert jnp.allclose(out, ref_q, atol=1e-3, rtol=1e-3), "mismatch vs bf16 reference"

    # Reference 2: full-f32 PyTorch math (loose tolerance for bf16 quantization).
    xf = x.reshape(B, -1)
    r1 = jnp.maximum(xf @ w1.T + b1, 0.0)
    r2 = jnp.maximum(r1 @ w2.T + b2, 0.0)
    ref_f32 = r2 @ w3.T + b3
    assert jnp.allclose(out, ref_f32, atol=5e-2, rtol=5e-2), "mismatch vs f32 reference"

    print("KERNEL_OK")
</pallas_src>

<mosaic_0001>
module attributes {stable_mosaic.version = 11 : i64} {
  func.func @_mlp_kernel(%arg0: i32, %arg1: memref<8x3072xf32, #tpu.memory_space<vmem>>, %arg2: memref<3072x128xbf16, #tpu.memory_space<vmem>>, %arg3: memref<1x128xf32, #tpu.memory_space<vmem>>, %arg4: memref<128x128xbf16, #tpu.memory_space<vmem>>, %arg5: memref<1x128xf32, #tpu.memory_space<vmem>>, %arg6: memref<128x128xbf16, #tpu.memory_space<vmem>>, %arg7: memref<1x128xf32, #tpu.memory_space<vmem>>, %arg8: memref<8x128xf32, #tpu.memory_space<vmem>>) attributes {dimension_semantics = [#tpu.dimension_semantics<parallel>], iteration_bounds = array<i64: 1>, scalar_prefetch = 0 : i64, scratch_operands = 0 : i64, tpu.core_type = #tpu.core_type<tc>, window_params = [{transform_indices = @transform_0, window_bounds = array<i64: 8, 3072>}, {pipeline_mode = #tpu.pipeline_mode<synchronous>, transform_indices = @transform_1, window_bounds = array<i64: 3072, 128>}, {pipeline_mode = #tpu.pipeline_mode<synchronous>, transform_indices = @transform_2, window_bounds = array<i64: 1, 128>}, {pipeline_mode = #tpu.pipeline_mode<synchronous>, transform_indices = @transform_3, window_bounds = array<i64: 128, 128>}, {pipeline_mode = #tpu.pipeline_mode<synchronous>, transform_indices = @transform_4, window_bounds = array<i64: 1, 128>}, {pipeline_mode = #tpu.pipeline_mode<synchronous>, transform_indices = @transform_5, window_bounds = array<i64: 128, 128>}, {pipeline_mode = #tpu.pipeline_mode<synchronous>, transform_indices = @transform_6, window_bounds = array<i64: 1, 128>}, {transform_indices = @transform_7, window_bounds = array<i64: 8, 128>}]} {
    %c0 = arith.constant 0 : index
    %c0_0 = arith.constant 0 : index
    %0 = vector.load %arg1[%c0, %c0_0] : memref<8x3072xf32, #tpu.memory_space<vmem>>, vector<8x3072xf32>
    %1 = arith.truncf %0 : vector<8x3072xf32> to vector<8x3072xbf16>
    %c0_1 = arith.constant 0 : index
    %c0_2 = arith.constant 0 : index
    %2 = vector.load %arg2[%c0_1, %c0_2] : memref<3072x128xbf16, #tpu.memory_space<vmem>>, vector<3072x128xbf16>
    %cst = arith.constant dense<0.000000e+00> : vector<8x128xf32>
    %3 = tpu.matmul %1, %2, %cst {dimension_numbers = #tpu.dot_dimension_numbers<[1], [0], [0], [1], [0, 0, 1, 1], [], []>} : vector<8x3072xbf16>, vector<3072x128xbf16>, vector<8x128xf32> -> vector<8x128xf32>
    %c0_3 = arith.constant 0 : index
    %c0_4 = arith.constant 0 : index
    %4 = vector.load %arg3[%c0_3, %c0_4] : memref<1x128xf32, #tpu.memory_space<vmem>>, vector<1x128xf32>
    %5 = vector.broadcast %4 : vector<1x128xf32> to vector<8x128xf32>
    %6 = arith.addf %3, %5 : vector<8x128xf32>
    %cst_5 = arith.constant 0.000000e+00 : f32
    %7 = vector.broadcast %cst_5 : f32 to vector<8x128xf32>
    %8 = arith.maximumf %6, %7 : vector<8x128xf32>
    %9 = arith.truncf %8 : vector<8x128xf32> to vector<8x128xbf16>
    %c0_6 = arith.constant 0 : index
    %c0_7 = arith.constant 0 : index
    %10 = vector.load %arg4[%c0_6, %c0_7] : memref<128x128xbf16, #tpu.memory_space<vmem>>, vector<128x128xbf16>
    %cst_8 = arith.constant dense<0.000000e+00> : vector<8x128xf32>
    %11 = tpu.matmul %9, %10, %cst_8 {dimension_numbers = #tpu.dot_dimension_numbers<[1], [0], [0], [1], [0, 0, 1, 1], [], []>} : vector<8x128xbf16>, vector<128x128xbf16>, vector<8x128xf32> -> vector<8x128xf32>
    %c0_9 = arith.constant 0 : index
    %c0_10 = arith.constant 0 : index
    %12 = vector.load %arg5[%c0_9, %c0_10] : memref<1x128xf32, #tpu.memory_space<vmem>>, vector<1x128xf32>
    %13 = vector.broadcast %12 : vector<1x128xf32> to vector<8x128xf32>
    %14 = arith.addf %11, %13 : vector<8x128xf32>
    %cst_11 = arith.constant 0.000000e+00 : f32
    %15 = vector.broadcast %cst_11 : f32 to vector<8x128xf32>
    %16 = arith.maximumf %14, %15 : vector<8x128xf32>
    %17 = arith.truncf %16 : vector<8x128xf32> to vector<8x128xbf16>
    %c0_12 = arith.constant 0 : index
    %c0_13 = arith.constant 0 : index
    %18 = vector.load %arg6[%c0_12, %c0_13] : memref<128x128xbf16, #tpu.memory_space<vmem>>, vector<128x128xbf16>
    %cst_14 = arith.constant dense<0.000000e+00> : vector<8x128xf32>
    %19 = tpu.matmul %17, %18, %cst_14 {dimension_numbers = #tpu.dot_dimension_numbers<[1], [0], [0], [1], [0, 0, 1, 1], [], []>} : vector<8x128xbf16>, vector<128x128xbf16>, vector<8x128xf32> -> vector<8x128xf32>
    %c0_15 = arith.constant 0 : index
    %c0_16 = arith.constant 0 : index
    %20 = vector.load %arg7[%c0_15, %c0_16] : memref<1x128xf32, #tpu.memory_space<vmem>>, vector<1x128xf32>
    %21 = vector.broadcast %20 : vector<1x128xf32> to vector<8x128xf32>
    %22 = arith.addf %19, %21 : vector<8x128xf32>
    %c0_17 = arith.constant 0 : index
    %c0_18 = arith.constant 0 : index
    %23 = vector.load %arg8[%c0_17, %c0_18] : memref<8x128xf32, #tpu.memory_space<vmem>>, vector<8x128xf32>
    tpu.vector_store %arg8[%c0_17, %c0_18], %22 {strides = array<i32>} : memref<8x128xf32, #tpu.memory_space<vmem>>, vector<8x128xf32>,
    return
  }
  func.func @transform_0(%arg0: i32) -> (i32, i32) {
    %c0_i32 = arith.constant 0 : i32
    %c0_i32_0 = arith.constant 0 : i32
    return %arg0, %c0_i32 : i32, i32
  }
  func.func @transform_1(%arg0: i32) -> (i32, i32) {
    %c0_i32 = arith.constant 0 : i32
    %c0_i32_0 = arith.constant 0 : i32
    %c0_i32_1 = arith.constant 0 : i32
    return %c0_i32, %c0_i32_0 : i32, i32
  }
  func.func @transform_2(%arg0: i32) -> (i32, i32) {
    %c0_i32 = arith.constant 0 : i32
    %c0_i32_0 = arith.constant 0 : i32
    %c0_i32_1 = arith.constant 0 : i32
    return %c0_i32, %c0_i32_0 : i32, i32
  }
  func.func @transform_3(%arg0: i32) -> (i32, i32) {
    %c0_i32 = arith.constant 0 : i32
    %c0_i32_0 = arith.constant 0 : i32
    %c0_i32_1 = arith.constant 0 : i32
    return %c0_i32, %c0_i32_0 : i32, i32
  }
  func.func @transform_4(%arg0: i32) -> (i32, i32) {
    %c0_i32 = arith.constant 0 : i32
    %c0_i32_0 = arith.constant 0 : i32
    %c0_i32_1 = arith.constant 0 : i32
    return %c0_i32, %c0_i32_0 : i32, i32
  }
  func.func @transform_5(%arg0: i32) -> (i32, i32) {
    %c0_i32 = arith.constant 0 : i32
    %c0_i32_0 = arith.constant 0 : i32
    %c0_i32_1 = arith.constant 0 : i32
    return %c0_i32, %c0_i32_0 : i32, i32
  }
  func.func @transform_6(%arg0: i32) -> (i32, i32) {
    %c0_i32 = arith.constant 0 : i32
    %c0_i32_0 = arith.constant 0 : i32
    %c0_i32_1 = arith.constant 0 : i32
    return %c0_i32, %c0_i32_0 : i32, i32
  }
  func.func @transform_7(%arg0: i32) -> (i32, i32) {
    %c0_i32 = arith.constant 0 : i32
    %c0_i32_0 = arith.constant 0 : i32
    return %arg0, %c0_i32 : i32, i32
  }
}

</mosaic_0001>

<bundles_post_ra>
// kernel: simple_cifar10_forward.1
= control target key start
LH: loop header
LB: loop body
LE: loop exit
PB: predicated region body
PF: predicated region fallthrough
CT: control target
= control target key end

     0   :  { %12 = vsyncpa [#allocation3], 0  ;;  %s3186_s27 = smov [#allocation2]   ;;  %s3187_s29 = smov 64   ;;  %s3364_s0 = inlined_call_operand.vmem [shape: f32[8,3072], index: 0, kind: input, shape index: {}]   ;;  %s3365_s1 = inlined_call_operand.hbm [shape: bf16[3072,128], index: 1, kind: input, shape index: {}]   ;;  %s3366_s2 = inlined_call_operand.vmem [shape: f32[1,128], index: 2, kind: input, shape index: {}]   ;;  %s3367_s3 = inlined_call_operand.vmem [shape: bf16[128,128], index: 3, kind: input, shape index: {}]   ;;  %s3368_s4 = inlined_call_operand.vmem [shape: f32[1,128], index: 4, kind: input, shape index: {}]   ;;  %s3369_s5 = inlined_call_operand.vmem [shape: bf16[128,128], index: 5, kind: input, shape index: {}]   ;;  %s3370_s6 = inlined_call_operand.vmem [shape: f32[1,128], index: 6, kind: input, shape index: {}]   ;;  %s3371_s7 = inlined_call_operand.vmem [shape: f32[8,128], index: 7, kind: output, shape index: {}]  }
   0x1   :  { %s19_s26 = sshll.u32 %s3365_s1, 4  ;;  %s21_s28 = sshll.u32 %s3186_s27, 4  ;;  %s20_s26 = int_to_ptr.hbm [resolvable:$true] %s19_s26  ;;  %s22_s28 = int_to_ptr.vmem [resolvable:$true] %s21_s28 }
   0x2   :  { %s3188_s30 = smov 4  }
   0x3   :  { %27 = dma.hbm_to_vmem [thread:$0]  %s20_s26, 24576, %s22_s28, [#allocation3], %s3187_s29, %s3187_s29, %s3188_s30  }
   0x4   :  { %3184 = dma.done.wait [#allocation3], 24576  }
   0x5   :  { %3185 = vsyncadd [#allocation3], 4294942720  ;;  %v2953_v0 = vld [vmem:[#allocation2 + $0x38] sm:$0xff]  ;;  %v2952_v4 = vld [vmem:[#allocation2 + $0x30] sm:$0xff] }
   0x6   :  { %v2961_v1 = vld [vmem:[#allocation2 + $0x78] sm:$0xff]  ;;  %1630 = vmatpush.bf16.msra.mxu0 %v2953_v0  ;;  %v2960_v5 = vld [vmem:[#allocation2 + $0x70] sm:$0xff]  ;;  %v2951_v8 = vld [vmem:[#allocation2 + $0x28] sm:$0xff] }
   0x7   :  { %v2969_v2 = vld [vmem:[#allocation2 + $0xb8] sm:$0xff]  ;;  %1643 = vmatpush.bf16.msra.mxu1 %v2961_v1  ;;  %v2968_v6 = vld [vmem:[#allocation2 + $0xb0] sm:$0xff]  ;;  %v2959_v9 = vld [vmem:[#allocation2 + $0x68] sm:$0xff] }
   0x8   :  { %v2977_v3 = vld [vmem:[#allocation2 + $0xf8] sm:$0xff]  ;;  %1656 = vmatpush.bf16.msra.mxu2 %v2969_v2  ;;  %v2976_v7 = vld [vmem:[#allocation2 + $0xf0] sm:$0xff]  ;;  %v2967_v10 = vld [vmem:[#allocation2 + $0xa8] sm:$0xff] }
   0x9   :  { %1669 = vmatpush.bf16.msra.mxu3 %v2977_v3  ;;  %v2975_v11 = vld [vmem:[#allocation2 + $0xe8] sm:$0xff]  ;;  %v2950_v12 = vld [vmem:[#allocation2 + $0x20] sm:$0xff]  ;;  %v2949_v16 = vld [vmem:[#allocation2 + $0x18] sm:$0xff] }
   0xa   :  { %1631 = vmatpush.bf16.msra.mxu0 %v2952_v4  ;;  %v2958_v13 = vld [vmem:[#allocation2 + $0x60] sm:$0xff]  ;;  %v2957_v17 = vld [vmem:[#allocation2 + $0x58] sm:$0xff]  ;;  %v2948_v20 = vld [vmem:[#allocation2 + $0x10] sm:$0xff] }
   0xb   :  { %1644 = vmatpush.bf16.msra.mxu1 %v2960_v5  ;;  %v2966_v14 = vld [vmem:[#allocation2 + $0xa0] sm:$0xff]  ;;  %v2965_v18 = vld [vmem:[#allocation2 + $0x98] sm:$0xff]  ;;  %v2956_v21 = vld [vmem:[#allocation2 + $0x50] sm:$0xff] }
   0xc   :  { %1657 = vmatpush.bf16.msra.mxu2 %v2968_v6  ;;  %v2974_v15 = vld [vmem:[#allocation2 + $0xe0] sm:$0xff]  ;;  %v2973_v19 = vld [vmem:[#allocation2 + $0xd8] sm:$0xff]  ;;  %v2964_v22 = vld [vmem:[#allocation2 + $0x90] sm:$0xff] }
   0xd   :  { %1670 = vmatpush.bf16.msra.mxu3 %v2976_v7  ;;  %v2972_v23 = vld [vmem:[#allocation2 + $0xd0] sm:$0xff]  ;;  %v2947_v24 = vld [vmem:[#allocation2 + $0x8] sm:$0xff]  ;;  %v2946_v28 = vld [vmem:[#allocation2] sm:$0xff] }
   0xe   :  { %1632 = vmatpush.bf16.msra.mxu0 %v2951_v8  ;;  %v2955_v25 = vld [vmem:[#allocation2 + $0x48] sm:$0xff]  ;;  %v2954_v29 = vld [vmem:[#allocation2 + $0x40] sm:$0xff]  ;;  %v2985_v32 = vld [vmem:[#allocation2 + $0x138] sm:$0xff] }
   0xf   :  { %1645 = vmatpush.bf16.msra.mxu1 %v2959_v9  ;;  %v2963_v26 = vld [vmem:[#allocation2 + $0x88] sm:$0xff]  ;;  %v2962_v30 = vld [vmem:[#allocation2 + $0x80] sm:$0xff]  ;;  %v44_v33 = vld [vmem:[%s3364_s0 + $0x10] sm:$0xff] }
  0x10   :  { %1658 = vmatpush.bf16.msra.mxu2 %v2967_v10  ;;  %v2971_v27 = vld [vmem:[#allocation2 + $0xc8] sm:$0xff]  ;;  %v2970_v31 = vld [vmem:[#allocation2 + $0xc0] sm:$0xff]  ;;  %v2993_v35 = vld [vmem:[#allocation2 + $0x178] sm:$0xff]  ;;  %v68_v40 = vpack.c.bf16 %v44_v33, %v44_v33 }
  0x11   :  { %1671 = vmatpush.bf16.msra.mxu3 %v2975_v11  ;;  %v42_v34 = vld [vmem:[%s3364_s0] sm:$0xff]  ;;  %v45_v36 = vld [vmem:[%s3364_s0 + $0x18] sm:$0xff]  ;;  %v43_v37 = vld [vmem:[%s3364_s0 + $0x8] sm:$0xff] }
  0x12   :  { %1633 = vmatpush.bf16.msra.mxu0 %v2950_v12  ;;  %v3001_v38 = vld [vmem:[#allocation2 + $0x1b8] sm:$0xff]  ;;  %v66_v41 = vpack.c.bf16 %v42_v34, %v42_v34  ;;  %v69_v42 = vpack.c.bf16 %v45_v36, %v45_v36  ;;  %v67_v43 = vpack.c.bf16 %v43_v37, %v43_v37  ;;  %v2984_v44 = vld [vmem:[#allocation2 + $0x130] sm:$0xff]  ;;  %v2983_v48 = vld [vmem:[#allocation2 + $0x128] sm:$0xff] }
  0x13   :  { %1646 = vmatpush.bf16.msra.mxu1 %v2958_v13  ;;  %v3009_v39 = vld [vmem:[#allocation2 + $0x1f8] sm:$0xff]  ;;  %v2992_v45 = vld [vmem:[#allocation2 + $0x170] sm:$0xff]  ;;  %v2991_v49 = vld [vmem:[#allocation2 + $0x168] sm:$0xff] }
  0x14   :  { %1659 = vmatpush.bf16.msra.mxu2 %v2966_v14  ;;  %v3000_v46 = vld [vmem:[#allocation2 + $0x1b0] sm:$0xff]  ;;  %v2999_v50 = vld [vmem:[#allocation2 + $0x1a8] sm:$0xff]  ;;  %v2982_v52 = vld [vmem:[#allocation2 + $0x120] sm:$0xff] }
  0x15   :  { %1672 = vmatpush.bf16.msra.mxu3 %v2974_v15  ;;  %v3008_v47 = vld [vmem:[#allocation2 + $0x1f0] sm:$0xff]  ;;  %v3007_v51 = vld [vmem:[#allocation2 + $0x1e8] sm:$0xff]  ;;  %v2990_v53 = vld [vmem:[#allocation2 + $0x160] sm:$0xff] }
  0x16   :  { %1634 = vmatpush.bf16.msra.mxu0 %v2949_v16  ;;  %v2998_v54 = vld [vmem:[#allocation2 + $0x1a0] sm:$0xff]  ;;  %v2981_v56 = vld [vmem:[#allocation2 + $0x118] sm:$0xff]  ;;  %v2980_v60 = vld [vmem:[#allocation2 + $0x110] sm:$0xff] }
  0x17   :  { %1647 = vmatpush.bf16.msra.mxu1 %v2957_v17  ;;  %v3006_v55 = vld [vmem:[#allocation2 + $0x1e0] sm:$0xff]  ;;  %v2989_v57 = vld [vmem:[#allocation2 + $0x158] sm:$0xff]  ;;  %v2988_v61 = vld [vmem:[#allocation2 + $0x150] sm:$0xff] }
  0x18   :  { %1660 = vmatpush.bf16.msra.mxu2 %v2965_v18  ;;  %v2997_v58 = vld [vmem:[#allocation2 + $0x198] sm:$0xff]  ;;  %v2996_v62 = vld [vmem:[#allocation2 + $0x190] sm:$0xff]  ;;  %v2979_v0 = vld [vmem:[#allocation2 + $0x108] sm:$0xff] }
  0x19   :  { %1673 = vmatpush.bf16.msra.mxu3 %v2973_v19  ;;  %v3005_v59 = vld [vmem:[#allocation2 + $0x1d8] sm:$0xff]  ;;  %v3004_v63 = vld [vmem:[#allocation2 + $0x1d0] sm:$0xff]  ;;  %v2987_v1 = vld [vmem:[#allocation2 + $0x148] sm:$0xff] }
  0x1a   :  { %1635 = vmatpush.bf16.msra.mxu0 %v2948_v20  ;;  %v2995_v2 = vld [vmem:[#allocation2 + $0x188] sm:$0xff]  ;;  %v2978_v4 = vld [vmem:[#allocation2 + $0x100] sm:$0xff]  ;;  %v3017_v8 = vld [vmem:[#allocation2 + $0x238] sm:$0xff] }
  0x1b   :  { %1648 = vmatpush.bf16.msra.mxu1 %v2956_v21  ;;  %v3003_v3 = vld [vmem:[#allocation2 + $0x1c8] sm:$0xff]  ;;  %v2986_v5 = vld [vmem:[#allocation2 + $0x140] sm:$0xff]  ;;  %v48_v9 = vld [vmem:[%s3364_s0 + $0x30] sm:$0xff] }
  0x1c   :  { %1661 = vmatpush.bf16.msra.mxu2 %v2964_v22  ;;  %v2994_v6 = vld [vmem:[#allocation2 + $0x180] sm:$0xff]  ;;  %v3025_v11 = vld [vmem:[#allocation2 + $0x278] sm:$0xff]  ;;  %v47_v13 = vld [vmem:[%s3364_s0 + $0x28] sm:$0xff]  ;;  %v72_v16 = vpack.c.bf16 %v48_v9, %v48_v9 }
  0x1d   :  { %1674 = vmatpush.bf16.msra.mxu3 %v2972_v23  ;;  %v3002_v7 = vld [vmem:[#allocation2 + $0x1c0] sm:$0xff]  ;;  %v49_v12 = vld [vmem:[%s3364_s0 + $0x38] sm:$0xff]  ;;  %v71_v19 = vpack.c.bf16 %v47_v13, %v47_v13  ;;  %v3016_v20 = vld [vmem:[#allocation2 + $0x230] sm:$0xff] }
  0x1e   :  { %1636 = vmatpush.bf16.msra.mxu0 %v2947_v24  ;;  %v46_v10 = vld [vmem:[%s3364_s0 + $0x20] sm:$0xff]  ;;  %v3033_v14 = vld [vmem:[#allocation2 + $0x2b8] sm:$0xff]  ;;  %v73_v18 = vpack.c.bf16 %v49_v12, %v49_v12  ;;  %v3024_v21 = vld [vmem:[#allocation2 + $0x270] sm:$0xff] }
  0x1f   :  { %1649 = vmatpush.bf16.msra.mxu1 %v2955_v25  ;;  %v3041_v15 = vld [vmem:[#allocation2 + $0x2f8] sm:$0xff]  ;;  %v70_v17 = vpack.c.bf16 %v46_v10, %v46_v10  ;;  %v3032_v22 = vld [vmem:[#allocation2 + $0x2b0] sm:$0xff]  ;;  %v3015_v24 = vld [vmem:[#allocation2 + $0x228] sm:$0xff] }
  0x20   :  { %1662 = vmatpush.bf16.msra.mxu2 %v2963_v26  ;;  %v3040_v23 = vld [vmem:[#allocation2 + $0x2f0] sm:$0xff]  ;;  %v3023_v25 = vld [vmem:[#allocation2 + $0x268] sm:$0xff]  ;;  %v3021_v33 = vld [vmem:[#allocation2 + $0x258] sm:$0xff] }
  0x21   :  { %1675 = vmatpush.bf16.msra.mxu3 %v2971_v27  ;;  %v3031_v26 = vld [vmem:[#allocation2 + $0x2a8] sm:$0xff]  ;;  %v3029_v34 = vld [vmem:[#allocation2 + $0x298] sm:$0xff]  ;;  %v3012_v36 = vld [vmem:[#allocation2 + $0x210] sm:$0xff] }
  0x22   :  { %1637 = vmatpush.bf16.msra.mxu0 %v2946_v28  ;;  %v3039_v27 = vld [vmem:[#allocation2 + $0x2e8] sm:$0xff]  ;;  %v3014_v28 = vld [vmem:[#allocation2 + $0x220] sm:$0xff]  ;;  %v3020_v37 = vld [vmem:[#allocation2 + $0x250] sm:$0xff] }
  0x23   :  { %1650 = vmatpush.bf16.msra.mxu1 %v2954_v29  ;;  %v3022_v29 = vld [vmem:[#allocation2 + $0x260] sm:$0xff]  ;;  %v3053_v9 = vld [vmem:[#allocation2 + $0x358] sm:$0xff]  ;;  %v3044_v12 = vld [vmem:[#allocation2 + $0x310] sm:$0xff] }
  0x24   :  { %1663 = vmatpush.bf16.msra.mxu2 %v2962_v30  ;;  %v3030_v30 = vld [vmem:[#allocation2 + $0x2a0] sm:$0xff]  ;;  %v3061_v10 = vld [vmem:[#allocation2 + $0x398] sm:$0xff]  ;;  %v3052_v13 = vld [vmem:[#allocation2 + $0x350] sm:$0xff] }
  0x25   :  { %1676 = vmatpush.bf16.msra.mxu3 %v2970_v31  ;;  %1638 = vmatmul.bf16.vlgmr.msra.gmra.mxu0 %v66_v41  ;;  %v3038_v31 = vld [vmem:[#allocation2 + $0x2e0] sm:$0xff]  ;;  %v3019_v41 = vld [vmem:[#allocation2 + $0x248] sm:$0xff] }
  0x26   :  { %1682 = vmatpush.bf16.msrb.mxu0 %v2985_v32  ;;  %1651 = vmatmul.bf16.vlgmr.msra.gmra.mxu1 %v67_v43  ;;  %v3013_v32 = vld [vmem:[#allocation2 + $0x218] sm:$0xff]  ;;  %v3035_v43 = vld [vmem:[#allocation2 + $0x2c8] sm:$0xff] }
  0x27   :  { %1695 = vmatpush.bf16.msrb.mxu1 %v2993_v35  ;;  %1664 = vmatmul.bf16.vlgmr.msra.gmra.mxu2 %v68_v40  ;;  %v3037_v35 = vld [vmem:[#allocation2 + $0x2d8] sm:$0xff]  ;;  %v3011_v40 = vld [vmem:[#allocation2 + $0x208] sm:$0xff] }
  0x28   :  { %1708 = vmatpush.bf16.msrb.mxu2 %v3001_v38  ;;  %1677 = vmatmul.bf16.vlgmr.msra.gmra.mxu3 %v69_v42  ;;  %v3028_v38 = vld [vmem:[#allocation2 + $0x290] sm:$0xff]  ;;  %v3027_v42 = vld [vmem:[#allocation2 + $0x288] sm:$0xff] }
  0x29   :  { %1721 = vmatpush.bf16.msrb.mxu3 %v3009_v39  ;;  %v3036_v39 = vld [vmem:[#allocation2 + $0x2d0] sm:$0xff] }
  0x2a   :  { %1683 = vmatpush.bf16.msrb.mxu0 %v2984_v44  ;;  %v3010_v44 = vld [vmem:[#allocation2 + $0x200] sm:$0xff] }
  0x2b   :  { %1696 = vmatpush.bf16.msrb.mxu1 %v2992_v45  ;;  %v3018_v45 = vld [vmem:[#allocation2 + $0x240] sm:$0xff] }
  0x2c   :  { %1709 = vmatpush.bf16.msrb.mxu2 %v3000_v46  ;;  %v3026_v46 = vld [vmem:[#allocation2 + $0x280] sm:$0xff] }
  0x2d   :  { %1722 = vmatpush.bf16.msrb.mxu3 %v3008_v47  ;;  %v3034_v47 = vld [vmem:[#allocation2 + $0x2c0] sm:$0xff] }
  0x2e   :  { %1684 = vmatpush.bf16.msrb.mxu0 %v2983_v48  ;;  %v3049_v48 = vld [vmem:[#allocation2 + $0x338] sm:$0xff] }
  0x2f   :  { %1697 = vmatpush.bf16.msrb.mxu1 %v2991_v49  ;;  %v50_v49 = vld [vmem:[%s3364_s0 + $0x40] sm:$0xff] }
  0x30   :  { %1710 = vmatpush.bf16.msrb.mxu2 %v2999_v50  ;;  %v52_v50 = vld [vmem:[%s3364_s0 + $0x50] sm:$0xff] }
  0x31   :  { %1723 = vmatpush.bf16.msrb.mxu3 %v3007_v51  ;;  %v3057_v51 = vld [vmem:[#allocation2 + $0x378] sm:$0xff] }
  0x32   :  { %1685 = vmatpush.bf16.msrb.mxu0 %v2982_v52  ;;  %v51_v52 = vld [vmem:[%s3364_s0 + $0x48] sm:$0xff] }
  0x33   :  { %1698 = vmatpush.bf16.msrb.mxu1 %v2990_v53  ;;  %v53_v53 = vld [vmem:[%s3364_s0 + $0x58] sm:$0xff] }
  0x34   :  { %1711 = vmatpush.bf16.msrb.mxu2 %v2998_v54  ;;  %v3065_v54 = vld [vmem:[#allocation2 + $0x3b8] sm:$0xff] }
  0x35   :  { %1724 = vmatpush.bf16.msrb.mxu3 %v3006_v55  ;;  %v3073_v55 = vld [vmem:[#allocation2 + $0x3f8] sm:$0xff] }
  0x36   :  { %1686 = vmatpush.bf16.msrb.mxu0 %v2981_v56  ;;  %v74_v56 = vpack.c.bf16 %v50_v49, %v50_v49  ;;  %v3085_v49 = vld [vmem:[#allocation2 + $0x458] sm:$0xff] }
  0x37   :  { %1699 = vmatpush.bf16.msrb.mxu1 %v2989_v57  ;;  %v76_v57 = vpack.c.bf16 %v52_v50, %v52_v50  ;;  %v3093_v50 = vld [vmem:[#allocation2 + $0x498] sm:$0xff] }
  0x38   :  { %1712 = vmatpush.bf16.msrb.mxu2 %v2997_v58  ;;  %v75_v58 = vpack.c.bf16 %v51_v52, %v51_v52  ;;  %v3076_v52 = vld [vmem:[#allocation2 + $0x410] sm:$0xff] }
  0x39   :  { %1725 = vmatpush.bf16.msrb.mxu3 %v3005_v59  ;;  %v77_v59 = vpack.c.bf16 %v53_v53, %v53_v53  ;;  %v3084_v53 = vld [vmem:[#allocation2 + $0x450] sm:$0xff] }
  0x3a   :  { %1687 = vmatpush.bf16.msrb.mxu0 %v2980_v60  ;;  %v3048_v60 = vld [vmem:[#allocation2 + $0x330] sm:$0xff] }
  0x3b   :  { %1700 = vmatpush.bf16.msrb.mxu1 %v2988_v61  ;;  %v3056_v61 = vld [vmem:[#allocation2 + $0x370] sm:$0xff] }
  0x3c   :  { %1713 = vmatpush.bf16.msrb.mxu2 %v2996_v62  ;;  %v3064_v62 = vld [vmem:[#allocation2 + $0x3b0] sm:$0xff] }
  0x3d   :  { %1726 = vmatpush.bf16.msrb.mxu3 %v3004_v63  ;;  %v3072_v63 = vld [vmem:[#allocation2 + $0x3f0] sm:$0xff] }
  0x3e   :  { %1688 = vmatpush.bf16.msrb.mxu0 %v2979_v0  ;;  %v3047_v0 = vld [vmem:[#allocation2 + $0x328] sm:$0xff] }
  0x3f   :  { %1701 = vmatpush.bf16.msrb.mxu1 %v2987_v1  ;;  %v3055_v1 = vld [vmem:[#allocation2 + $0x368] sm:$0xff] }
  0x40   :  { %1714 = vmatpush.bf16.msrb.mxu2 %v2995_v2  ;;  %v3063_v2 = vld [vmem:[#allocation2 + $0x3a8] sm:$0xff] }
  0x41   :  { %1727 = vmatpush.bf16.msrb.mxu3 %v3003_v3  ;;  %v3071_v3 = vld [vmem:[#allocation2 + $0x3e8] sm:$0xff] }
  0x42   :  { %1689 = vmatpush.bf16.msrb.mxu0 %v2978_v4  ;;  %v3046_v4 = vld [vmem:[#allocation2 + $0x320] sm:$0xff] }
  0x43   :  { %1702 = vmatpush.bf16.msrb.mxu1 %v2986_v5  ;;  %v3054_v5 = vld [vmem:[#allocation2 + $0x360] sm:$0xff] }
  0x44   :  { %1715 = vmatpush.bf16.msrb.mxu2 %v2994_v6  ;;  %v3062_v6 = vld [vmem:[#allocation2 + $0x3a0] sm:$0xff] }
  0x45   :  { %1728 = vmatpush.bf16.msrb.mxu3 %v3002_v7  ;;  %1690 = vmatmul.bf16.vlgmr.msrb.gmra.mxu0 %v70_v17  ;;  %v3070_v7 = vld [vmem:[#allocation2 + $0x3e0] sm:$0xff]  ;;  %v3051_v17 = vld [vmem:[#allocation2 + $0x348] sm:$0xff] }
  0x46   :  { %1734 = vmatpush.bf16.msra.mxu0 %v3017_v8  ;;  %1703 = vmatmul.bf16.vlgmr.msrb.gmra.mxu1 %v71_v19  ;;  %v3045_v8 = vld [vmem:[#allocation2 + $0x318] sm:$0xff]  ;;  %v3067_v19 = vld [vmem:[#allocation2 + $0x3c8] sm:$0xff] }
  0x47   :  { %1747 = vmatpush.bf16.msra.mxu1 %v3025_v11  ;;  %1716 = vmatmul.bf16.vlgmr.msrb.gmra.mxu2 %v72_v16  ;;  %v3069_v11 = vld [vmem:[#allocation2 + $0x3d8] sm:$0xff]  ;;  %v3043_v16 = vld [vmem:[#allocation2 + $0x308] sm:$0xff] }
  0x48   :  { %1760 = vmatpush.bf16.msra.mxu2 %v3033_v14  ;;  %1729 = vmatmul.bf16.vlgmr.msrb.gmra.mxu3 %v73_v18  ;;  %v3060_v14 = vld [vmem:[#allocation2 + $0x390] sm:$0xff]  ;;  %v3059_v18 = vld [vmem:[#allocation2 + $0x388] sm:$0xff] }
  0x49   :  { %1773 = vmatpush.bf16.msra.mxu3 %v3041_v15  ;;  %v3068_v15 = vld [vmem:[#allocation2 + $0x3d0] sm:$0xff] }
  0x4a   :  { %1735 = vmatpush.bf16.msra.mxu0 %v3016_v20  ;;  %v3042_v20 = vld [vmem:[#allocation2 + $0x300] sm:$0xff] }
  0x4b   :  { %1748 = vmatpush.bf16.msra.mxu1 %v3024_v21  ;;  %v3050_v21 = vld [vmem:[#allocation2 + $0x340] sm:$0xff] }
  0x4c   :  { %1761 = vmatpush.bf16.msra.mxu2 %v3032_v22  ;;  %v3058_v22 = vld [vmem:[#allocation2 + $0x380] sm:$0xff] }
  0x4d   :  { %1774 = vmatpush.bf16.msra.mxu3 %v3040_v23  ;;  %v3066_v23 = vld [vmem:[#allocation2 + $0x3c0] sm:$0xff] }
  0x4e   :  { %1736 = vmatpush.bf16.msra.mxu0 %v3015_v24  ;;  %v3081_v24 = vld [vmem:[#allocation2 + $0x438] sm:$0xff] }
  0x4f   :  { %1749 = vmatpush.bf16.msra.mxu1 %v3023_v25  ;;  %v54_v25 = vld [vmem:[%s3364_s0 + $0x60] sm:$0xff] }
  0x50   :  { %1762 = vmatpush.bf16.msra.mxu2 %v3031_v26  ;;  %v56_v26 = vld [vmem:[%s3364_s0 + $0x70] sm:$0xff] }
  0x51   :  { %1775 = vmatpush.bf16.msra.mxu3 %v3039_v27  ;;  %v3089_v27 = vld [vmem:[#allocation2 + $0x478] sm:$0xff] }
  0x52   :  { %1737 = vmatpush.bf16.msra.mxu0 %v3014_v28  ;;  %v55_v28 = vld [vmem:[%s3364_s0 + $0x68] sm:$0xff] }
  0x53   :  { %1750 = vmatpush.bf16.msra.mxu1 %v3022_v29  ;;  %v57_v29 = vld [vmem:[%s3364_s0 + $0x78] sm:$0xff] }
  0x54   :  { %1763 = vmatpush.bf16.msra.mxu2 %v3030_v30  ;;  %v3097_v30 = vld [vmem:[#allocation2 + $0x4b8] sm:$0xff] }
  0x55   :  { %1776 = vmatpush.bf16.msra.mxu3 %v3038_v31  ;;  %v3105_v31 = vld [vmem:[#allocation2 + $0x4f8] sm:$0xff] }
  0x56   :  { %1738 = vmatpush.bf16.msra.mxu0 %v3013_v32  ;;  %v78_v32 = vpack.c.bf16 %v54_v25, %v54_v25 }
  0x57   :  { %1751 = vmatpush.bf16.msra.mxu1 %v3021_v33  ;;  %v80_v33 = vpack.c.bf16 %v56_v26, %v56_v26  ;;  %v3126_v26 = vld [vmem:[#allocation2 + $0x5a0] sm:$0xff] }
  0x58   :  { %1764 = vmatpush.bf16.msra.mxu2 %v3029_v34  ;;  %v79_v34 = vpack.c.bf16 %v55_v28, %v55_v28 }
  0x59   :  { %1777 = vmatpush.bf16.msra.mxu3 %v3037_v35  ;;  %v81_v35 = vpack.c.bf16 %v57_v29, %v57_v29  ;;  %v3109_v29 = vld [vmem:[#allocation2 + $0x518] sm:$0xff] }
  0x5a   :  { %1739 = vmatpush.bf16.msra.mxu0 %v3012_v36  ;;  %v3080_v36 = vld [vmem:[#allocation2 + $0x430] sm:$0xff] }
  0x5b   :  { %1752 = vmatpush.bf16.msra.mxu1 %v3020_v37  ;;  %v3088_v37 = vld [vmem:[#allocation2 + $0x470] sm:$0xff] }
  0x5c   :  { %1765 = vmatpush.bf16.msra.mxu2 %v3028_v38  ;;  %v3096_v38 = vld [vmem:[#allocation2 + $0x4b0] sm:$0xff] }
  0x5d   :  { %1778 = vmatpush.bf16.msra.mxu3 %v3036_v39  ;;  %v3104_v39 = vld [vmem:[#allocation2 + $0x4f0] sm:$0xff] }
  0x5e   :  { %1740 = vmatpush.bf16.msra.mxu0 %v3011_v40  ;;  %v3079_v40 = vld [vmem:[#allocation2 + $0x428] sm:$0xff] }
  0x5f   :  { %1753 = vmatpush.bf16.msra.mxu1 %v3019_v41  ;;  %v3087_v41 = vld [vmem:[#allocation2 + $0x468] sm:$0xff] }
  0x60   :  { %1766 = vmatpush.bf16.msra.mxu2 %v3027_v42  ;;  %v3095_v42 = vld [vmem:[#allocation2 + $0x4a8] sm:$0xff] }
  0x61   :  { %1779 = vmatpush.bf16.msra.mxu3 %v3035_v43  ;;  %v3103_v43 = vld [vmem:[#allocation2 + $0x4e8] sm:$0xff] }
  0x62   :  { %1741 = vmatpush.bf16.msra.mxu0 %v3010_v44  ;;  %v3078_v44 = vld [vmem:[#allocation2 + $0x420] sm:$0xff] }
  0x63   :  { %1754 = vmatpush.bf16.msra.mxu1 %v3018_v45  ;;  %v3086_v45 = vld [vmem:[#allocation2 + $0x460] sm:$0xff] }
  0x64   :  { %1767 = vmatpush.bf16.msra.mxu2 %v3026_v46  ;;  %v3094_v46 = vld [vmem:[#allocation2 + $0x4a0] sm:$0xff] }
  0x65   :  { %1780 = vmatpush.bf16.msra.mxu3 %v3034_v47  ;;  %1742 = vmatmul.bf16.vlgmr.msra.gmra.mxu0 %v74_v56  ;;  %v3102_v47 = vld [vmem:[#allocation2 + $0x4e0] sm:$0xff]  ;;  %v3075_v56 = vld [vmem:[#allocation2 + $0x408] sm:$0xff] }
  0x66   :  { %1786 = vmatpush.bf16.msrb.mxu0 %v3049_v48  ;;  %1755 = vmatmul.bf16.vlgmr.msra.gmra.mxu1 %v75_v58  ;;  %v3077_v48 = vld [vmem:[#allocation2 + $0x418] sm:$0xff]  ;;  %v3091_v58 = vld [vmem:[#allocation2 + $0x488] sm:$0xff] }
  0x67   :  { %1799 = vmatpush.bf16.msrb.mxu1 %v3057_v51  ;;  %1768 = vmatmul.bf16.vlgmr.msra.gmra.mxu2 %v76_v57  ;;  %v3101_v51 = vld [vmem:[#allocation2 + $0x4d8] sm:$0xff]  ;;  %v3083_v57 = vld [vmem:[#allocation2 + $0x448] sm:$0xff] }
  0x68   :  { %1812 = vmatpush.bf16.msrb.mxu2 %v3065_v54  ;;  %1781 = vmatmul.bf16.vlgmr.msra.gmra.mxu3 %v77_v59  ;;  %v3092_v54 = vld [vmem:[#allocation2 + $0x490] sm:$0xff]  ;;  %v3099_v59 = vld [vmem:[#allocation2 + $0x4c8] sm:$0xff] }
  0x69   :  { %1825 = vmatpush.bf16.msrb.mxu3 %v3073_v55  ;;  %v3100_v55 = vld [vmem:[#allocation2 + $0x4d0] sm:$0xff] }
  0x6a   :  { %1787 = vmatpush.bf16.msrb.mxu0 %v3048_v60  ;;  %v3074_v60 = vld [vmem:[#allocation2 + $0x400] sm:$0xff] }
  0x6b   :  { %1800 = vmatpush.bf16.msrb.mxu1 %v3056_v61  ;;  %v3082_v61 = vld [vmem:[#allocation2 + $0x440] sm:$0xff] }
  0x6c   :  { %1813 = vmatpush.bf16.msrb.mxu2 %v3064_v62  ;;  %v3090_v62 = vld [vmem:[#allocation2 + $0x480] sm:$0xff] }
  0x6d   :  { %1826 = vmatpush.bf16.msrb.mxu3 %v3072_v63  ;;  %v3098_v63 = vld [vmem:[#allocation2 + $0x4c0] sm:$0xff] }
  0x6e   :  { %1788 = vmatpush.bf16.msrb.mxu0 %v3047_v0  ;;  %v3113_v0 = vld [vmem:[#allocation2 + $0x538] sm:$0xff] }
  0x6f   :  { %1801 = vmatpush.bf16.msrb.mxu1 %v3055_v1  ;;  %v58_v1 = vld [vmem:[%s3364_s0 + $0x80] sm:$0xff] }
  0x70   :  { %1814 = vmatpush.bf16.msrb.mxu2 %v3063_v2  ;;  %v60_v2 = vld [vmem:[%s3364_s0 + $0x90] sm:$0xff] }
  0x71   :  { %1827 = vmatpush.bf16.msrb.mxu3 %v3071_v3  ;;  %v3121_v3 = vld [vmem:[#allocation2 + $0x578] sm:$0xff] }
  0x72   :  { %1789 = vmatpush.bf16.msrb.mxu0 %v3046_v4  ;;  %v59_v4 = vld [vmem:[%s3364_s0 + $0x88] sm:$0xff] }
  0x73   :  { %1802 = vmatpush.bf16.msrb.mxu1 %v3054_v5  ;;  %v61_v5 = vld [vmem:[%s3364_s0 + $0x98] sm:$0xff] }
  0x74   :  { %1815 = vmatpush.bf16.msrb.mxu2 %v3062_v6  ;;  %v3129_v6 = vld [vmem:[#allocation2 + $0x5b8] sm:$0xff] }
  0x75   :  { %1828 = vmatpush.bf16.msrb.mxu3 %v3070_v7  ;;  %v3137_v7 = vld [vmem:[#allocation2 + $0x5f8] sm:$0xff] }
  0x76   :  { %1790 = vmatpush.bf16.msrb.mxu0 %v3045_v8  ;;  %v82_v8 = vpack.c.bf16 %v58_v1, %v58_v1 }
  0x77   :  { %1803 = vmatpush.bf16.msrb.mxu1 %v3053_v9  ;;  %v84_v9 = vpack.c.bf16 %v60_v2, %v60_v2 }
  0x78   :  { %1816 = vmatpush.bf16.msrb.mxu2 %v3061_v10  ;;  %v83_v10 = vpack.c.bf16 %v59_v4, %v59_v4 }
  0x79   :  { %1829 = vmatpush.bf16.msrb.mxu3 %v3069_v11  ;;  %v85_v11 = vpack.c.bf16 %v61_v5, %v61_v5 }
  0x7a   :  { %1791 = vmatpush.bf16.msrb.mxu0 %v3044_v12  ;;  %v3112_v12 = vld [vmem:[#allocation2 + $0x530] sm:$0xff] }
  0x7b   :  { %1804 = vmatpush.bf16.msrb.mxu1 %v3052_v13  ;;  %v3120_v13 = vld [vmem:[#allocation2 + $0x570] sm:$0xff] }
  0x7c   :  { %1817 = vmatpush.bf16.msrb.mxu2 %v3060_v14  ;;  %v3128_v14 = vld [vmem:[#allocation2 + $0x5b0] sm:$0xff] }
  0x7d   :  { %1830 = vmatpush.bf16.msrb.mxu3 %v3068_v15  ;;  %v3136_v15 = vld [vmem:[#allocation2 + $0x5f0] sm:$0xff] }
  0x7e   :  { %1792 = vmatpush.bf16.msrb.mxu0 %v3043_v16  ;;  %v3111_v16 = vld [vmem:[#allocation2 + $0x528] sm:$0xff] }
  0x7f   :  { %1805 = vmatpush.bf16.msrb.mxu1 %v3051_v17  ;;  %v3119_v17 = vld [vmem:[#allocation2 + $0x568] sm:$0xff] }
  0x80   :  { %1818 = vmatpush.bf16.msrb.mxu2 %v3059_v18  ;;  %v3157_v18 = vld [vmem:[%s3366_s2] ss:$0 sm:$0xff] }
  0x81   :  { %1831 = vmatpush.bf16.msrb.mxu3 %v3067_v19  ;;  %v3127_v19 = vld [vmem:[#allocation2 + $0x5a8] sm:$0xff] }
  0x82   :  { %1793 = vmatpush.bf16.msrb.mxu0 %v3042_v20  ;;  %v3135_v20 = vld [vmem:[#allocation2 + $0x5e8] sm:$0xff] }
  0x83   :  { %1806 = vmatpush.bf16.msrb.mxu1 %v3050_v21 }
  0x84   :  { %1819 = vmatpush.bf16.msrb.mxu2 %v3058_v22  ;;  %v3110_v22 = vld [vmem:[#allocation2 + $0x520] sm:$0xff] }
  0x85   :  { %1832 = vmatpush.bf16.msrb.mxu3 %v3066_v23  ;;  %1794 = vmatmul.bf16.vlgmr.msrb.gmra.mxu0 %v78_v32  ;;  %v3118_v23 = vld [vmem:[#allocation2 + $0x560] sm:$0xff]  ;;  %v3133_v32 = vld [vmem:[#allocation2 + $0x5d8] sm:$0xff] }
  0x86   :  { %1838 = vmatpush.bf16.msra.mxu0 %v3081_v24  ;;  %1807 = vmatmul.bf16.vlgmr.msrb.gmra.mxu1 %v79_v34 }
  0x87   :  { %1851 = vmatpush.bf16.msra.mxu1 %v3089_v27  ;;  %1820 = vmatmul.bf16.vlgmr.msrb.gmra.mxu2 %v80_v33  ;;  %v3134_v27 = vld [vmem:[#allocation2 + $0x5e0] sm:$0xff] }
  0x88   :  { %1864 = vmatpush.bf16.msra.mxu2 %v3097_v30  ;;  %1833 = vmatmul.bf16.vlgmr.msrb.gmra.mxu3 %v81_v35  ;;  %v3117_v30 = vld [vmem:[#allocation2 + $0x558] sm:$0xff] }
  0x89   :  { %1877 = vmatpush.bf16.msra.mxu3 %v3105_v31  ;;  %v3125_v31 = vld [vmem:[#allocation2 + $0x598] sm:$0xff] }
  0x8a   :  { %1839 = vmatpush.bf16.msra.mxu0 %v3080_v36 }
  0x8b   :  { %1852 = vmatpush.bf16.msra.mxu1 %v3088_v37  ;;  %v3108_v37 = vld [vmem:[#allocation2 + $0x510] sm:$0xff] }
  0x8c   :  { %1865 = vmatpush.bf16.msra.mxu2 %v3096_v38  ;;  %v3116_v38 = vld [vmem:[#allocation2 + $0x550] sm:$0xff] }
  0x8d   :  { %1878 = vmatpush.bf16.msra.mxu3 %v3104_v39 }
  0x8e   :  { %1840 = vmatpush.bf16.msra.mxu0 %v3079_v40 }
  0x8f   :  { %1853 = vmatpush.bf16.msra.mxu1 %v3087_v41  ;;  %v3124_v41 = vld [vmem:[#allocation2 + $0x590] sm:$0xff] }
  0x90   :  { %1866 = vmatpush.bf16.msra.mxu2 %v3095_v42  ;;  %v3132_v42 = vld [vmem:[#allocation2 + $0x5d0] sm:$0xff] }
  0x91   :  { %1879 = vmatpush.bf16.msra.mxu3 %v3103_v43  ;;  %v3107_v43 = vld [vmem:[#allocation2 + $0x508] sm:$0xff] }
  0x92   :  { %1841 = vmatpush.bf16.msra.mxu0 %v3078_v44  ;;  %v3115_v44 = vld [vmem:[#allocation2 + $0x548] sm:$0xff] }
  0x93   :  { %1854 = vmatpush.bf16.msra.mxu1 %v3086_v45  ;;  %v3123_v45 = vld [vmem:[#allocation2 + $0x588] sm:$0xff] }
  0x94   :  { %1867 = vmatpush.bf16.msra.mxu2 %v3094_v46  ;;  %v3131_v46 = vld [vmem:[#allocation2 + $0x5c8] sm:$0xff] }
  0x95   :  { %1880 = vmatpush.bf16.msra.mxu3 %v3102_v47 }
  0x96   :  { %1842 = vmatpush.bf16.msra.mxu0 %v3077_v48 }
  0x97   :  { %1855 = vmatpush.bf16.msra.mxu1 %v3085_v49  ;;  %v3106_v49 = vld [vmem:[#allocation2 + $0x500] sm:$0xff] }
  0x98   :  { %1868 = vmatpush.bf16.msra.mxu2 %v3093_v50  ;;  %v3114_v50 = vld [vmem:[#allocation2 + $0x540] sm:$0xff] }
  0x99   :  { %1881 = vmatpush.bf16.msra.mxu3 %v3101_v51  ;;  %v3122_v51 = vld [vmem:[#allocation2 + $0x580] sm:$0xff] }
  0x9a   :  { %1843 = vmatpush.bf16.msra.mxu0 %v3076_v52  ;;  %v62_v52 = vld [vmem:[%s3364_s0 + $0xa0] sm:$0xff] }
  0x9b   :  { %1856 = vmatpush.bf16.msra.mxu1 %v3084_v53  ;;  %v63_v53 = vld [vmem:[%s3364_s0 + $0xa8] sm:$0xff] }
  0x9c   :  { %1869 = vmatpush.bf16.msra.mxu2 %v3092_v54  ;;  %v3130_v54 = vld [vmem:[#allocation2 + $0x5c0] sm:$0xff] }
  0x9d   :  { %1882 = vmatpush.bf16.msra.mxu3 %v3100_v55  ;;  %v64_v55 = vld [vmem:[%s3364_s0 + $0xb0] sm:$0xff] }
  0x9e   :  { %1844 = vmatpush.bf16.msra.mxu0 %v3075_v56  ;;  %v65_v56 = vld [vmem:[%s3364_s0 + $0xb8] sm:$0xff] }
  0x9f   :  { %1857 = vmatpush.bf16.msra.mxu1 %v3083_v57  ;;  %v86_v57 = vpack.c.bf16 %v62_v52, %v62_v52  ;;  %v3151_v52 = vld [vmem:[%s3369_s5 + $0x28] sm:$0xff] }
  0xa0   :  { %1870 = vmatpush.bf16.msra.mxu2 %v3091_v58  ;;  %v87_v58 = vpack.c.bf16 %v63_v53, %v63_v53 }
  0xa1   :  { %1883 = vmatpush.bf16.msra.mxu3 %v3099_v59  ;;  %v88_v59 = vpack.c.bf16 %v64_v55, %v64_v55 }
  0xa2   :  { %1845 = vmatpush.bf16.msra.mxu0 %v3074_v60  ;;  %v1639_v21 = vpop.f32.mrf.mxu0  ;;  %v89_v60 = vpack.c.bf16 %v65_v56, %v65_v56  ;;  %v3149_v56 = vld [vmem:[%s3369_s5 + $0x18] sm:$0xff] }
  0xa3   :  { %1858 = vmatpush.bf16.msra.mxu1 %v3082_v61  ;;  %v1640_v24 = vadd.f32 %v3157_v18, %v1639_v21  ;;  %v1652_v25 = vpop.f32.mrf.mxu1 }
  0xa4   :  { %1871 = vmatpush.bf16.msra.mxu2 %v3090_v62 }
  0xa5   :  { %1884 = vmatpush.bf16.msra.mxu3 %v3098_v63  ;;  %1846 = vmatmul.bf16.vlgmr.msra.gmra.mxu0 %v82_v8  ;;  %v1653_v28 = vadd.f32 %v1652_v25, %v1640_v24  ;;  %v3145_v25 = vld [vmem:[%s3367_s3 + $0x38] sm:$0xff] }
  0xa6   :  { %1890 = vmatpush.bf16.msrb.mxu0 %v3113_v0  ;;  %1859 = vmatmul.bf16.vlgmr.msra.gmra.mxu1 %v83_v10 }
  0xa7   :  { %1903 = vmatpush.bf16.msrb.mxu1 %v3121_v3  ;;  %1872 = vmatmul.bf16.vlgmr.msra.gmra.mxu2 %v84_v9 }
  0xa8   :  { %1916 = vmatpush.bf16.msrb.mxu2 %v3129_v6  ;;  %1885 = vmatmul.bf16.vlgmr.msra.gmra.mxu3 %v85_v11 }
  0xa9   :  { %1929 = vmatpush.bf16.msrb.mxu3 %v3137_v7 }
  0xaa   :  { %1891 = vmatpush.bf16.msrb.mxu0 %v3112_v12  ;;  %v1665_v33 = vpop.f32.mrf.mxu2  ;;  %v1641_v36 = vpop.f32.mrf.mxu0 }
  0xab   :  { %1904 = vmatpush.bf16.msrb.mxu1 %v3120_v13  ;;  %v1666_v34 = vadd.f32 %v1665_v33, %v1653_v28  ;;  %v1678_v35 = vpop.f32.mrf.mxu3  ;;  %v1654_v40 = vpop.f32.mrf.mxu1  ;;  %v3144_v28 = vld [vmem:[%s3367_s3 + $0x30] sm:$0xff]  ;;  %v3141_v33 = vld [vmem:[%s3367_s3 + $0x18] sm:$0xff] }
  0xac   :  { %1917 = vmatpush.bf16.msrb.mxu2 %v3128_v14 }
  0xad   :  { %1930 = vmatpush.bf16.msrb.mxu3 %v3136_v15  ;;  %v1679_v39 = vadd.f32 %v1678_v35, %v1666_v34  ;;  %v3140_v35 = vld [vmem:[%s3367_s3 + $0x10] sm:$0xff] }
  0xae   :  { %1892 = vmatpush.bf16.msrb.mxu0 %v3111_v16 }
  0xaf   :  { %1905 = vmatpush.bf16.msrb.mxu1 %v3119_v17 }
  0xb0   :  { %1918 = vmatpush.bf16.msrb.mxu2 %v3127_v19 }
  0xb1   :  { %1931 = vmatpush.bf16.msrb.mxu3 %v3135_v20 }
  0xb2   :  { %1893 = vmatpush.bf16.msrb.mxu0 %v3110_v22  ;;  %v1667_v47 = vpop.f32.mrf.mxu2 }
  0xb3   :  { %1906 = vmatpush.bf16.msrb.mxu1 %v3118_v23  ;;  %v1680_v48 = vpop.f32.mrf.mxu3 }
  0xb4   :  { %1919 = vmatpush.bf16.msrb.mxu2 %v3126_v26 }
  0xb5   :  { %1932 = vmatpush.bf16.msrb.mxu3 %v3134_v27 }
  0xb6   :  { %1894 = vmatpush.bf16.msrb.mxu0 %v3109_v29  ;;  %v3143_v29 = vld [vmem:[%s3367_s3 + $0x28] sm:$0xff] }
  0xb7   :  { %1907 = vmatpush.bf16.msrb.mxu1 %v3117_v30 }
  0xb8   :  { %1920 = vmatpush.bf16.msrb.mxu2 %v3125_v31 }
  0xb9   :  { %1933 = vmatpush.bf16.msrb.mxu3 %v3133_v32  ;;  %v3142_v32 = vld [vmem:[%s3367_s3 + $0x20] sm:$0xff] }
  0xba   :  { %1895 = vmatpush.bf16.msrb.mxu0 %v3108_v37  ;;  %v3139_v37 = vld [vmem:[%s3367_s3 + $0x8] sm:$0xff] }
  0xbb   :  { %1908 = vmatpush.bf16.msrb.mxu1 %v3116_v38 }
  0xbc   :  { %1921 = vmatpush.bf16.msrb.mxu2 %v3124_v41 }
  0xbd   :  { %1934 = vmatpush.bf16.msrb.mxu3 %v3132_v42  ;;  %v3138_v42 = vld [vmem:[%s3367_s3] sm:$0xff] }
  0xbe   :  { %1896 = vmatpush.bf16.msrb.mxu0 %v3107_v43 }
  0xbf   :  { %1909 = vmatpush.bf16.msrb.mxu1 %v3115_v44 }
  0xc0   :  { %1922 = vmatpush.bf16.msrb.mxu2 %v3123_v45 }
  0xc1   :  { %1935 = vmatpush.bf16.msrb.mxu3 %v3131_v46  ;;  %v3153_v46 = vld [vmem:[%s3369_s5 + $0x38] sm:$0xff] }
  0xc2   :  { %1897 = vmatpush.bf16.msrb.mxu0 %v3106_v49  ;;  %v1691_v61 = vpop.f32.mrf.mxu0  ;;  %v3152_v49 = vld [vmem:[%s3369_s5 + $0x30] sm:$0xff] }
  0xc3   :  { %1910 = vmatpush.bf16.msrb.mxu1 %v3114_v50  ;;  %v1692_v62 = vadd.f32 %v1691_v61, %v1679_v39  ;;  %v1704_v63 = vpop.f32.mrf.mxu1  ;;  %v3148_v61 = vld [vmem:[%s3369_s5 + $0x10] sm:$0xff] }
  0xc4   :  { %1923 = vmatpush.bf16.msrb.mxu2 %v3122_v51 }
  0xc5   :  { %1936 = vmatpush.bf16.msrb.mxu3 %v3130_v54  ;;  %1898 = vmatmul.bf16.vlgmr.msrb.gmra.mxu0 %v86_v57  ;;  %v1705_v0 = vadd.f32 %v1704_v63, %v1692_v62  ;;  %v3150_v54 = vld [vmem:[%s3369_s5 + $0x20] sm:$0xff] }
  0xc6   :  { %1911 = vmatmul.bf16.vlgmr.msrb.gmra.mxu1 %v87_v58  ;;  %2012 = vmatpush.bf16.msra.mxu0 %v3145_v25 }
  0xc7   :  { %1924 = vmatmul.bf16.vlgmr.msrb.gmra.mxu2 %v88_v59  ;;  %2095 = vmatpush.bf16.msra.mxu1 %v3153_v46 }
  0xc8   :  { %1937 = vmatmul.bf16.vlgmr.msrb.gmra.mxu3 %v89_v60 }
  0xca   :  { %v1717_v1 = vpop.f32.mrf.mxu2  ;;  %v1693_v4 = vpop.f32.mrf.mxu0  ;;  %2013 = vmatpush.bf16.msra.mxu0 %v3144_v28 }
  0xcb   :  { %v1718_v2 = vadd.f32 %v1717_v1, %v1705_v0  ;;  %v1730_v3 = vpop.f32.mrf.mxu3  ;;  %v1706_v6 = vpop.f32.mrf.mxu1  ;;  %2096 = vmatpush.bf16.msra.mxu1 %v3152_v49 }
  0xcd   :  { %v1731_v5 = vadd.f32 %v1730_v3, %v1718_v2 }
  0xce   :  { %2014 = vmatpush.bf16.msra.mxu0 %v3143_v29 }
  0xcf   :  { %2097 = vmatpush.bf16.msra.mxu1 %v3151_v52 }
  0xd2   :  { %v1719_v7 = vpop.f32.mrf.mxu2  ;;  %2015 = vmatpush.bf16.msra.mxu0 %v3142_v32 }
  0xd3   :  { %v1732_v8 = vpop.f32.mrf.mxu3  ;;  %2098 = vmatpush.bf16.msra.mxu1 %v3150_v54 }
  0xd6   :  { %2016 = vmatpush.bf16.msra.mxu0 %v3141_v33 }
  0xd7   :  { %2099 = vmatpush.bf16.msra.mxu1 %v3149_v56 }
  0xda   :  { %2017 = vmatpush.bf16.msra.mxu0 %v3140_v35 }
  0xdb   :  { %2100 = vmatpush.bf16.msra.mxu1 %v3148_v61 }
  0xde   :  { %2018 = vmatpush.bf16.msra.mxu0 %v3139_v37 }
  0xe2   :  { %v1743_v9 = vpop.f32.mrf.mxu0  ;;  %2019 = vmatpush.bf16.msra.mxu0 %v3138_v42 }
  0xe3   :  { %v1744_v10 = vadd.f32 %v1743_v9, %v1731_v5  ;;  %v1756_v11 = vpop.f32.mrf.mxu1  ;;  %v3147_v9 = vld [vmem:[%s3369_s5 + $0x8] sm:$0xff] }
  0xe4   :  { %2101 = vmatpush.bf16.msra.mxu1 %v3147_v9 }
  0xe5   :  { %v1757_v12 = vadd.f32 %v1756_v11, %v1744_v10  ;;  %v3146_v10 = vld [vmem:[%s3369_s5] sm:$0xff] }
  0xe6   :  { %v3158_v11 = vld [vmem:[%s3368_s4] ss:$0 sm:$0xff] }
  0xe8   :  { %2102 = vmatpush.bf16.msra.mxu1 %v3146_v10 }
  0xea   :  { %v1769_v13 = vpop.f32.mrf.mxu2  ;;  %v1745_v16 = vpop.f32.mrf.mxu0 }
  0xeb   :  { %v1770_v14 = vadd.f32 %v1769_v13, %v1757_v12  ;;  %v1782_v15 = vpop.f32.mrf.mxu3  ;;  %v1758_v18 = vpop.f32.mrf.mxu1 }
  0xed   :  { %v1783_v17 = vadd.f32 %v1782_v15, %v1770_v14 }
  0xf2   :  { %v1771_v19 = vpop.f32.mrf.mxu2 }
  0xf3   :  { %v1784_v20 = vpop.f32.mrf.mxu3 }
 0x102   :  { %v1795_v21 = vpop.f32.mrf.mxu0 }
 0x103   :  { %v1808_v22 = vpop.f32.mrf.mxu1  ;;  %v1796_v39 = vadd.f32 %v1795_v21, %v1783_v17  ;;  %v3159_v17 = vld [vmem:[%s3370_s6] ss:$0 sm:$0xff] }
 0x105   :  { %v1809_v44 = vadd.f32 %v1808_v22, %v1796_v39 }
 0x10a   :  { %v1821_v23 = vpop.f32.mrf.mxu2  ;;  %v1797_v26 = vpop.f32.mrf.mxu0 }
 0x10b   :  { %v1834_v24 = vpop.f32.mrf.mxu3  ;;  %v1810_v27 = vpop.f32.mrf.mxu1  ;;  %v1822_v45 = vadd.f32 %v1821_v23, %v1809_v44 }
 0x10d   :  { %v1835_v50 = vadd.f32 %v1834_v24, %v1822_v45 }
 0x112   :  { %v1823_v30 = vpop.f32.mrf.mxu2 }
 0x113   :  { %v1836_v31 = vpop.f32.mrf.mxu3 }
 0x122   :  { %v1847_v34 = vpop.f32.mrf.mxu0 }
 0x123   :  { %v1860_v36 = vpop.f32.mrf.mxu1  ;;  %v1848_v51 = vadd.f32 %v1847_v34, %v1835_v50 }
 0x125   :  { %v1861_v53 = vadd.f32 %v1860_v36, %v1848_v51 }
 0x12a   :  { %v1873_v38 = vpop.f32.mrf.mxu2  ;;  %v1849_v41 = vpop.f32.mrf.mxu0 }
 0x12b   :  { %v1886_v40 = vpop.f32.mrf.mxu3  ;;  %v1862_v43 = vpop.f32.mrf.mxu1  ;;  %v1874_v55 = vadd.f32 %v1873_v38, %v1861_v53 }
 0x12d   :  { %v1887_v57 = vadd.f32 %v1886_v40, %v1874_v55 }
 0x132   :  { %v1875_v47 = vpop.f32.mrf.mxu2 }
 0x133   :  { %v1888_v48 = vpop.f32.mrf.mxu3 }
 0x142   :  { %v1899_v58 = vpop.f32.mrf.mxu0 }
 0x143   :  { %v1912_v59 = vpop.f32.mrf.mxu1  ;;  %v1900_v60 = vadd.f32 %v1899_v58, %v1887_v57 }
 0x145   :  { %v1913_v62 = vadd.f32 %v1912_v59, %v1900_v60 }
 0x14a   :  { %v1925_v63 = vpop.f32.mrf.mxu2  ;;  %v1901_v2 = vpop.f32.mrf.mxu0 }
 0x14b   :  { %v1938_v0 = vpop.f32.mrf.mxu3  ;;  %v1926_v1 = vadd.f32 %v1925_v63, %v1913_v62  ;;  %v1914_v3 = vpop.f32.mrf.mxu1 }
 0x14d   :  { %v1939_v4 = vadd.f32 %v1938_v0, %v1926_v1 }
 0x14f   :  { %v1942_v5 = vmax.f32 %v1939_v4, 0.0 }
 0x151   :  { %v1943_v6 = vpack.c.bf16 %v1942_v5, %v1942_v5 }
 0x152   :  { %v1927_v7 = vpop.f32.mrf.mxu2 }
 0x153   :  { %v1940_v8 = vpop.f32.mrf.mxu3  ;;  %2020 = vmatmul.bf16.vlgmr.msra.gmra.mxu0 %v1943_v6 }
 0x1d0   :  { %v2021_v12 = vpop.f32.mrf.mxu0 }
 0x1d1   :  { %v2022_v13 = vadd.f32 %v3158_v11, %v2021_v12 }
 0x1d3   :  { %v2025_v14 = vmax.f32 %v2022_v13, 0.0 }
 0x1d5   :  { %v2026_v15 = vpack.c.bf16 %v2025_v14, %v2025_v14 }
 0x1d7   :  { %2103 = vmatmul.bf16.vlgmr.msra.gmra.mxu1 %v2026_v15 }
 0x1d8   :  { %v2023_v16 = vpop.f32.mrf.mxu0 }
 0x254   :  { %v2104_v18 = vpop.f32.mrf.mxu1 }
 0x255   :  { %v2105_v19 = vadd.f32 %v3159_v17, %v2104_v18 }
 0x257   :  { %2108 = vst [vmem:[%s3371_s7] sm:$0xff] %v2105_v19 }
 0x25c   :  { %v2106_v20 = vpop.f32.mrf.mxu1 }
 0x25d   :  { %2113 = vsyncpa [#allocation3], 1 }

</bundles_post_ra>
